<compile_context>
chip_gen: v6e
topology: v6e:2x2x1
jax: 0.10.0
libtpu: 0.0.40
codegen_flags: <defaults>
</compile_context>

<pallas_src>
import functools

import jax
import jax.numpy as jnp
from jax.experimental import pallas as pl
from jax.experimental.pallas import tpu as pltpu


# Whole-array (ungridded) VMEM spec — at tiny B the entire working set is <1 KiB.
_VMEM_SPEC = pl.BlockSpec(memory_space=pltpu.MemorySpace.VMEM)

# Rows per grid step on the large-batch path (~512 rows reaches ~85% of HBM roofline
# while amortizing the ~0.35 µs per-grid-step overhead; trivially inside 64 MiB VMEM).
_BATCH_TILE = 512


def _act(x):
    # sigmoid(relu(tanh(x))):  relu(tanh(x)) == 0  <=>  x <= 0, and sigmoid(0) = 0.5,
    # so the max drops out and only the two EUP transcendentals remain.
    return jnp.where(x > 0, jax.nn.sigmoid(jnp.tanh(x)), 0.5)


def _model_kernel(x_ref, w_ref, b_ref, o_ref):
    # x_ref: (TB, C*L)   w_ref: (C*L, OUT)  [concat-folded]   b_ref: (1, OUT)
    # o_ref: (TB, OUT)
    o_ref[...] = (
        jnp.dot(_act(x_ref[...]), w_ref[...], preferred_element_type=jnp.float32)
        + b_ref[...]
    )


def prepare_params(weight, bias):
    """One-time parameter preparation (outside the per-forward path).

    weight: (OUT, IN) torch layout, IN = 2*C*L.  Because the elementwise chain
    distributes over cat((x, x), dim=1), fold the two weight halves on the
    transposed (IN, OUT) layout:  W_folded = W.T[:IN//2] + W.T[IN//2:].
    """
    out_f, in_f = weight.shape
    assert in_f % 2 == 0, "concat fold requires even in_features"
    half = in_f // 2
    w_t = weight.T.astype(jnp.float32)                  # (IN, OUT)
    w_folded = w_t[:half, :] + w_t[half:, :]            # (IN//2, OUT)
    b2d = bias.reshape(1, out_f).astype(jnp.float32)    # (1, OUT)
    return w_folded, b2d


@jax.jit
def model_forward(x, w_folded, b2d):
    """x: (B, C, L) float32; w_folded: (C*L, OUT); b2d: (1, OUT)."""
    B = x.shape[0]
    K, out_f = w_folded.shape
    xf = x.reshape(B, K).astype(jnp.float32)            # (B, C*L)

    if B >= _BATCH_TILE and B % _BATCH_TILE == 0:
        # Large-batch path: tile the batch; weight/bias stay resident across steps.
        return pl.pallas_call(
            _model_kernel,
            out_shape=jax.ShapeDtypeStruct((B, out_f), jnp.float32),
            grid_spec=pltpu.PrefetchScalarGridSpec(
                num_scalar_prefetch=0,
                grid=(B // _BATCH_TILE,),
                in_specs=[
                    pl.BlockSpec((_BATCH_TILE, K), lambda i: (i, 0)),
                    pl.BlockSpec((K, out_f), lambda i: (0, 0)),
                    pl.BlockSpec((1, out_f), lambda i: (0, 0)),
                ],
                out_specs=pl.BlockSpec((_BATCH_TILE, out_f), lambda i: (i, 0)),
            ),
            compiler_params=pltpu.CompilerParams(
                dimension_semantics=("parallel",)),  # megacore sharding on v7x
        )(xf, w_folded, b2d)

    # Small-batch path: one whole-array VMEM block, no grid/pipeline machinery.
    # (In production a batch this small would simply be left to XLA fusion.)
    return pl.pallas_call(
        _model_kernel,
        out_shape=jax.ShapeDtypeStruct((B, out_f), jnp.float32),
        in_specs=[_VMEM_SPEC, _VMEM_SPEC, _VMEM_SPEC],
        out_specs=_VMEM_SPEC,
    )(xf, w_folded, b2d)


def _reference(x, weight, bias):
    """Pure-JAX reference of the (fixed-shape) PyTorch forward, with the concat."""
    B = x.shape[0]
    xf = x.reshape(B, -1)
    t1 = jnp.concatenate([xf, xf], axis=1)               # cat((x, x), dim=1).view(B, -1)
    t5 = jax.nn.sigmoid(jax.nn.relu(jnp.tanh(t1)))
    return t5 @ weight.T + bias


if __name__ == "__main__":
    key = jax.random.PRNGKey(0)
    kx, kw, kb, kx2 = jax.random.split(key, 4)

    B, C, L = 2, 3, 4
    OUT = 5
    IN = 2 * C * L  # 24 (flattened size after cat along dim=1)

    x = jax.random.normal(kx, (B, C, L), dtype=jnp.float32)

    # deterministic Linear params (PyTorch-style uniform init bounds)
    bound = 1.0 / (IN ** 0.5)
    weight = jax.random.uniform(kw, (OUT, IN), minval=-bound, maxval=bound,
                                dtype=jnp.float32)
    bias = jax.random.uniform(kb, (OUT,), minval=-bound, maxval=bound,
                              dtype=jnp.float32)

    # one-time parameter preparation (transpose + concat fold + bias reshape)
    w_folded, b2d = prepare_params(weight, bias)

    # --- small-batch (module-spec) shape ---
    out = model_forward(x, w_folded, b2d)
    out = jax.block_until_ready(out)
    ref = _reference(x, weight, bias)
    assert out.shape == (B, OUT)
    assert jnp.allclose(out, ref, atol=1e-5, rtol=1e-5)

    # --- large-batch path sanity check (gridded, parallel batch axis) ---
    B_big = 1024
    x_big = jax.random.normal(kx2, (B_big, C, L), dtype=jnp.float32)
    out_big = jax.block_until_ready(model_forward(x_big, w_folded, b2d))
    ref_big = _reference(x_big, weight, bias)
    assert out_big.shape == (B_big, OUT)
    assert jnp.allclose(out_big, ref_big, atol=1e-5, rtol=1e-5)

    print("KERNEL_OK")
</pallas_src>

<mosaic_0001>
module attributes {stable_mosaic.version = 11 : i64} {
  func.func @_model_kernel(%arg0: memref<2x12xf32, #tpu.memory_space<vmem>>, %arg1: memref<12x5xf32, #tpu.memory_space<vmem>>, %arg2: memref<1x5xf32, #tpu.memory_space<vmem>>, %arg3: memref<2x5xf32, #tpu.memory_space<vmem>>) attributes {dimension_semantics = [], scalar_prefetch = 0 : i64, scratch_operands = 0 : i64, tpu.core_type = #tpu.core_type<tc>} {
    %c0 = arith.constant 0 : index
    %c0_0 = arith.constant 0 : index
    %0 = vector.load %arg0[%c0, %c0_0] : memref<2x12xf32, #tpu.memory_space<vmem>>, vector<2x12xf32>
    %cst = arith.constant 0.000000e+00 : f32
    %1 = vector.broadcast %cst : f32 to vector<2x12xf32>
    %2 = arith.cmpf ogt, %0, %1 : vector<2x12xf32>
    %3 = math.tanh %0 : vector<2x12xf32>
    %4 = arith.negf %3 : vector<2x12xf32>
    %5 = math.exp %4 : vector<2x12xf32>
    %cst_1 = arith.constant 1.000000e+00 : f32
    %6 = vector.broadcast %cst_1 : f32 to vector<2x12xf32>
    %7 = arith.addf %6, %5 : vector<2x12xf32>
    %8 = arith.divf %6, %7 : vector<2x12xf32>
    %cst_2 = arith.constant 5.000000e-01 : f32
    %9 = vector.broadcast %cst_2 : f32 to vector<2x12xf32>
    %10 = arith.select %2, %8, %9 : vector<2x12xi1>, vector<2x12xf32>
    %c0_3 = arith.constant 0 : index
    %c0_4 = arith.constant 0 : index
    %11 = vector.load %arg1[%c0_3, %c0_4] : memref<12x5xf32, #tpu.memory_space<vmem>>, vector<12x5xf32>
    %cst_5 = arith.constant dense<0.000000e+00> : vector<2x5xf32>
    %12 = tpu.matmul %10, %11, %cst_5 {dimension_numbers = #tpu.dot_dimension_numbers<[1], [0], [0], [1], [0, 0, 1, 1], [], []>} : vector<2x12xf32>, vector<12x5xf32>, vector<2x5xf32> -> vector<2x5xf32>
    %c0_6 = arith.constant 0 : index
    %c0_7 = arith.constant 0 : index
    %13 = vector.load %arg2[%c0_6, %c0_7] : memref<1x5xf32, #tpu.memory_space<vmem>>, vector<1x5xf32>
    %14 = vector.broadcast %13 : vector<1x5xf32> to vector<2x5xf32>
    %15 = arith.addf %12, %14 : vector<2x5xf32>
    %c0_8 = arith.constant 0 : index
    %c0_9 = arith.constant 0 : index
    %16 = vector.load %arg3[%c0_8, %c0_9] : memref<2x5xf32, #tpu.memory_space<vmem>>, vector<2x5xf32>
    tpu.vector_store %arg3[%c0_8, %c0_9], %15 {strides = array<i32>} : memref<2x5xf32, #tpu.memory_space<vmem>>, vector<2x5xf32>,
    return
  }
}

</mosaic_0001>

<bundles_post_ra>
// kernel: model_forward.1
= control target key start
LH: loop header
LB: loop body
LE: loop exit
PB: predicated region body
PF: predicated region fallthrough
CT: control target
= control target key end

     0   :  { %vm38_vm0 = vcmask 1043456   ;;  %v173_v1 = vmov 0.0   ;;  %vm174_vm1 = vmmov 0   ;;  %s211_s0 = inlined_call_operand.vmem [shape: f32[2,12], index: 0, kind: input, shape index: {}]   ;;  %s212_s1 = inlined_call_operand.vmem [shape: f32[12,5], index: 1, kind: input, shape index: {}]   ;;  %s213_s2 = inlined_call_operand.vmem [shape: f32[1,5], index: 2, kind: input, shape index: {}]   ;;  %s214_s3 = inlined_call_operand.hbm [shape: f32[2,5], index: 3, kind: output, shape index: {}]  }
   0x1   :  { %v26_v0 = vld [vmem:[%s212_s1 + $0x8] sm:$0xf]  ;;  %135 = vmatprep.subr.mxu0 %v173_v1  ;;  %v25_v2 = vld [vmem:[%s212_s1] sm:$0xff]  ;;  %139 = vmatprep.mubr.msk.f32.mxu0 %vm174_vm1, %v173_v1 }
   0x2   :  { %v15_v3 = vld [vmem:[%s211_s0] sm:$0x3]  ;;  %136 = vmatpush3.msk.msra.mxu0 %vm38_vm0, %v26_v0 }
   0x3   :  { %145 = vtanh.f32 %v15_v3 }
   0x4   :  { %8 = vsyncpa [#allocation3], 0  ;;  %137 = vmatprep.subr.mxu0 %v173_v1  ;;  %vm16_vm2 = vcmp.gt.f32.partialorder %v15_v3, 0.0  ;;  %vm34_vm3 = vcmask 97280   ;;  %v129_v10 = vld [vmem:[%s213_s2] ss:$0 sm:$0xff] }
   0x5   :  { %138 = vmatpush3.msra.mxu0 %v25_v2  ;;  %s175_s0 = smov [#allocation2]   ;;  %vm112_vm4 = vcmask 33792  }
   0x6   :  { %s120_s19 = sshll.u32 %s175_s0, 4  ;;  %s121_s19 = int_to_ptr.vmem [resolvable:$true] %s120_s19 }
   0x7   :  { %s151_s20 = scalar_lea.vmem %s121_s19, 32  ;;  %p156_p1 = scmp.lt.s32.totalorder %s121_s19, %s121_s19 }
   0x8   :  { %p152_p0 = scmp.ne.s32.totalorder %s121_s19, %s151_s20  ;;  %p157_p2 = scmp.lt.s32.totalorder %s151_s20, %s151_s20 }
   0xa   :  { %p158_p3 = por %p157_p2, %p156_p1 }
   0xc   :  { %p159_p4 = pnand %p158_p3, %p152_p0 }
  0x10   :  { %v146_v4 = vpop.eup %145 }
  0x11   :  { %v128_v5 = vmul.f32 -1.442695, %v146_v4 }
  0x13   :  { %147 = vpow2.f32 %v128_v5 }
  0x20   :  { %v148_v6 = vpop.eup %147 }
  0x21   :  { %v21_v7 = vadd.f32 1.0, %v148_v6 }
  0x23   :  { %149 = vrcp.f32 %v21_v7 }
  0x30   :  { %v150_v8 = vpop.eup %149 }
  0x31   :  { %v24_v9 = vsel %vm16_vm2, %v150_v8, 0.5 }
  0x32   :  { %140 = vmatmul.mubr.msk.f32.vlgmr.msra.gmra.mxu0 %vm34_vm3, %v24_v9 }
  0xf2   :  { %v108_v11 = vpop.f32.mrf.mxu0 }
  0xf3   :  { %v109_v12 = vadd.f32 %v129_v10, %v108_v11 }
  0xf4   :  { %v141_v13 = vpop.f32.mrf.mxu0 }
  0xf5   :  { %113 = vst.msk [vmem:[#allocation2] sm:$0x3] %vm112_vm4, %v109_v12 }
  0xf6   :  { %162 = shalt.err (!%p159_p4)
}
  0xf7   :  { %123 = dma.vmem_to_hbm [thread:$0]  %s121_s19, 32, %s214_s3, [#allocation3]  }
  0xf8   :  { %171 = dma.done.wait [#allocation3], 32  }
  0xf9   :  { %172 = vsyncadd [#allocation3], 4294967264 }
  0xfa   :  { %127 = vsyncpa [#allocation3], 1 }

</bundles_post_ra>
